<compile_context>
chip_gen: v7x
topology: tpu7x:2x2x1
jax: 0.10.0
libtpu: 0.0.40
codegen_flags: <defaults>
</compile_context>

<pallas_src>
import functools

import jax
import jax.numpy as jnp
from jax.experimental import pallas as pl
from jax.experimental.pallas import tpu as pltpu


def _round_up(x, m):
    return (x + m - 1) // m * m


def qvalue_kernel(xt_ref, p_ref, out_ref, *, state_dim, hidden_dim, action_dim):
    """Transposed dueling forward for one batch block.

    xt_ref : [state_dim, B]                    (batch on the lane axis)
    p_ref  : [2*Hp + HP, Cw + 8] param slab    (see pack_params)
    out_ref: [action_dim, B]                   q-values, transposed
    """
    S, H, A = state_dim, hidden_dim, action_dim
    Hp = _round_up(H, 8)           # sublane-aligned hidden size
    HP = _round_up(A + 1, 8)       # padded adv|val head rows
    Cw = max(S, Hp)                # weight-region width; bias cols follow

    xt = xt_ref[...]                                    # [S, B]

    # Static slices into the packed slab (sublane offsets are multiples of 8).
    w1t = p_ref[0:Hp, 0:S]                              # [Hp, S]
    b1 = p_ref[0:Hp, Cw:Cw + 1]                         # [Hp, 1]
    w2t = p_ref[Hp:2 * Hp, 0:Hp]                        # [Hp, Hp]
    b2 = p_ref[Hp:2 * Hp, Cw + 1:Cw + 2]                # [Hp, 1]
    wht = p_ref[2 * Hp:2 * Hp + HP, 0:Hp]               # [HP, Hp] (zero-padded rows)
    bh = p_ref[2 * Hp:2 * Hp + HP, Cw + 2:Cw + 3]       # [HP, 1]

    h1 = jnp.maximum(
        jnp.dot(w1t, xt, preferred_element_type=jnp.float32) + b1, 0.0)   # [Hp, B]
    h2 = jnp.maximum(
        jnp.dot(w2t, h1, preferred_element_type=jnp.float32) + b2, 0.0)   # [Hp, B]

    # Fused advantage|value head: one MXU matmul over the full padded slab.
    head = jnp.dot(wht, h2, preferred_element_type=jnp.float32) + bh      # [HP, B]
    adv = head[0:A, :]                                  # [A, B]
    val = head[A:A + 1, :]                              # [1, B]

    # dueling combine: value + adv - adv.mean(dim=action, keepdims)
    adv_mean = jnp.sum(adv, axis=0, keepdims=True) * (1.0 / A)            # [1, B]
    out_ref[...] = (val + adv - adv_mean).astype(out_ref.dtype)


def pack_params(params, state_dim, hidden_dim, action_dim):
    """One-time host-side packing of all weights/biases into one slab.

    Layout (rows x cols), Hp = roundup(H,8), HP = roundup(A+1,8), Cw = max(S,Hp):
      rows [0 , Hp)        cols [0, S):  W1^T     col Cw   : b1
      rows [Hp, 2Hp)       cols [0, H):  W2^T     col Cw+1 : b2
      rows [2Hp, 2Hp+HP)   cols [0, H):  [Wa|Wv]^T col Cw+2 : [ba|bv]
    All padding is zero, so padded rows/cols never change results.
    """
    S, H, A = state_dim, hidden_dim, action_dim
    Hp = _round_up(H, 8)
    HP = _round_up(A + 1, 8)
    Cw = max(S, Hp)
    slab = jnp.zeros((2 * Hp + HP, Cw + 8), jnp.float32)

    slab = slab.at[0:H, 0:S].set(params["w1"].T)
    slab = slab.at[0:H, Cw].set(params["b1"].reshape(-1))

    slab = slab.at[Hp:Hp + H, 0:H].set(params["w2"].T)
    slab = slab.at[Hp:Hp + H, Cw + 1].set(params["b2"].reshape(-1))

    wh_t = jnp.concatenate([params["wa"], params["wv"]], axis=1).T   # [A+1, H]
    bh = jnp.concatenate([params["ba"], params["bv"]], axis=1).reshape(-1)
    slab = slab.at[2 * Hp:2 * Hp + A + 1, 0:H].set(wh_t)
    slab = slab.at[2 * Hp:2 * Hp + A + 1, Cw + 2].set(bh)
    return slab


def qvalue_action_net(state, params_slab, *, hidden_dim, action_dim,
                      batch_block=4096, gridless_max_batch=8192):
    """state: [B, state_dim] f32.  params_slab: from pack_params().  -> [B, A]."""
    B, state_dim = state.shape
    kernel = functools.partial(
        qvalue_kernel, state_dim=state_dim, hidden_dim=hidden_dim,
        action_dim=action_dim)

    # Batch rides the lane axis inside the kernel.
    x_t = jnp.transpose(state)                               # [S, B]
    out_t_shape = jax.ShapeDtypeStruct((action_dim, B), jnp.float32)

    if B <= gridless_max_batch or B <= batch_block:
        # Gridless path: no pipeline bookkeeping / double buffering; whole
        # arrays are VMEM-resident blocks.  Preferred up to many thousands of
        # rows because per-grid-step overhead dominates this tiny net.
        vmem = functools.partial(pl.BlockSpec,
                                 memory_space=pltpu.MemorySpace.VMEM)
        out_t = pl.pallas_call(
            kernel,
            out_shape=out_t_shape,
            in_specs=[vmem(), vmem()],
            out_specs=vmem(),
        )(x_t, params_slab)
    else:
        # Large-batch path: tile the (lane) batch axis, keep the param slab
        # grid-invariant.  Tiling here is overhead-driven, not VMEM-driven:
        # even on v7x (64 MiB physical VMEM) a 4096-row block is well under
        # 1 MiB double-buffered.
        assert B % batch_block == 0 and batch_block % 128 == 0
        pr, pc = params_slab.shape
        out_t = pl.pallas_call(
            kernel,
            out_shape=out_t_shape,
            grid=(B // batch_block,),
            in_specs=[
                pl.BlockSpec((state_dim, batch_block), lambda i: (0, i)),
                pl.BlockSpec((pr, pc), lambda i: (0, 0)),
            ],
            out_specs=pl.BlockSpec((action_dim, batch_block), lambda i: (0, i)),
            compiler_params=pltpu.CompilerParams(
                dimension_semantics=("parallel",)),
        )(x_t, params_slab)

    return jnp.transpose(out_t)                              # [B, A]


def init_params(key, state_dim, hidden_dim, action_dim):
    """Deterministic synthetic init (PyTorch-Linear-like uniform scaling)."""
    ks = jax.random.split(key, 8)

    def lin(kw, kb, fan_in, fan_out):
        bound = 1.0 / float(fan_in) ** 0.5
        w = jax.random.uniform(kw, (fan_in, fan_out), jnp.float32, -bound, bound)
        b = jax.random.uniform(kb, (1, fan_out), jnp.float32, -bound, bound)
        return w, b

    w1, b1 = lin(ks[0], ks[1], state_dim, hidden_dim)
    w2, b2 = lin(ks[2], ks[3], hidden_dim, hidden_dim)
    wa, ba = lin(ks[4], ks[5], hidden_dim, action_dim)
    wv, bv = lin(ks[6], ks[7], hidden_dim, 1)
    return dict(w1=w1, b1=b1, w2=w2, b2=b2, wa=wa, ba=ba, wv=wv, bv=bv)


def reference(state, p):
    h1 = jnp.maximum(state @ p["w1"] + p["b1"], 0.0)
    h2 = jnp.maximum(h1 @ p["w2"] + p["b2"], 0.0)
    adv = h2 @ p["wa"] + p["ba"]
    val = h2 @ p["wv"] + p["bv"]
    return val + adv - adv.mean(axis=1, keepdims=True)


if __name__ == "__main__":
    key = jax.random.PRNGKey(0)
    k_state, k_params, k_big = jax.random.split(key, 3)

    state_dim, hidden_dim, action_dim = 16, 32, 4
    params = init_params(k_params, state_dim, hidden_dim, action_dim)
    slab = pack_params(params, state_dim, hidden_dim, action_dim)

    # Small batch -> gridless, whole-array-VMEM path (the common case).
    B = 8
    state = jax.random.normal(k_state, (B, state_dim), jnp.float32)
    out = qvalue_action_net(state, slab,
                            hidden_dim=hidden_dim, action_dim=action_dim)
    out = jax.block_until_ready(out)
    ref = reference(state, params)
    assert out.shape == (B, action_dim)
    assert jnp.allclose(out, ref, atol=1e-4, rtol=1e-4), "mismatch (gridless)"

    # Exercise the batch-tiled path (real workloads only hit it for
    # B > gridless_max_batch; forced here at small size to validate the path).
    Bt = 512
    state_big = jax.random.normal(k_big, (Bt, state_dim), jnp.float32)
    out_big = qvalue_action_net(state_big, slab,
                                hidden_dim=hidden_dim, action_dim=action_dim,
                                batch_block=256, gridless_max_batch=0)
    out_big = jax.block_until_ready(out_big)
    ref_big = reference(state_big, params)
    assert out_big.shape == (Bt, action_dim)
    assert jnp.allclose(out_big, ref_big, atol=1e-4, rtol=1e-4), "mismatch (tiled)"

    print("KERNEL_OK")
</pallas_src>

<mosaic_0001>
module attributes {stable_mosaic.version = 11 : i64} {
  func.func @qvalue_kernel(%arg0: memref<16x8xf32, #tpu.memory_space<vmem>>, %arg1: memref<72x40xf32, #tpu.memory_space<vmem>>, %arg2: memref<4x8xf32, #tpu.memory_space<vmem>>) attributes {dimension_semantics = [], scalar_prefetch = 0 : i64, scratch_operands = 0 : i64, tpu.core_type = #tpu.core_type<tc>} {
    %c0 = arith.constant 0 : index
    %c0_0 = arith.constant 0 : index
    %0 = vector.load %arg0[%c0, %c0_0] : memref<16x8xf32, #tpu.memory_space<vmem>>, vector<16x8xf32>
    %c0_1 = arith.constant 0 : index
    %c0_2 = arith.constant 0 : index
    %1 = vector.load %arg1[%c0_1, %c0_2] : memref<72x40xf32, #tpu.memory_space<vmem>>, vector<32x16xf32>
    %c0_3 = arith.constant 0 : index
    %c32 = arith.constant 32 : index
    %2 = vector.load %arg1[%c0_3, %c32] : memref<72x40xf32, #tpu.memory_space<vmem>>, vector<32x1xf32>
    %c32_4 = arith.constant 32 : index
    %c0_5 = arith.constant 0 : index
    %3 = vector.load %arg1[%c32_4, %c0_5] : memref<72x40xf32, #tpu.memory_space<vmem>>, vector<32x32xf32>
    %c32_6 = arith.constant 32 : index
    %c33 = arith.constant 33 : index
    %4 = vector.load %arg1[%c32_6, %c33] : memref<72x40xf32, #tpu.memory_space<vmem>>, vector<32x1xf32>
    %c64 = arith.constant 64 : index
    %c0_7 = arith.constant 0 : index
    %5 = vector.load %arg1[%c64, %c0_7] : memref<72x40xf32, #tpu.memory_space<vmem>>, vector<8x32xf32>
    %c64_8 = arith.constant 64 : index
    %c34 = arith.constant 34 : index
    %6 = vector.load %arg1[%c64_8, %c34] : memref<72x40xf32, #tpu.memory_space<vmem>>, vector<8x1xf32>
    %cst = arith.constant dense<0.000000e+00> : vector<32x8xf32>
    %7 = tpu.matmul %1, %0, %cst {dimension_numbers = #tpu.dot_dimension_numbers<[1], [0], [0], [1], [0, 0, 1, 1], [], []>} : vector<32x16xf32>, vector<16x8xf32>, vector<32x8xf32> -> vector<32x8xf32>
    %8 = vector.broadcast %2 : vector<32x1xf32> to vector<32x8xf32>
    %9 = arith.addf %7, %8 : vector<32x8xf32>
    %cst_9 = arith.constant 0.000000e+00 : f32
    %10 = vector.broadcast %cst_9 : f32 to vector<32x8xf32>
    %11 = arith.maximumf %9, %10 : vector<32x8xf32>
    %cst_10 = arith.constant dense<0.000000e+00> : vector<32x8xf32>
    %12 = tpu.matmul %3, %11, %cst_10 {dimension_numbers = #tpu.dot_dimension_numbers<[1], [0], [0], [1], [0, 0, 1, 1], [], []>} : vector<32x32xf32>, vector<32x8xf32>, vector<32x8xf32> -> vector<32x8xf32>
    %13 = vector.broadcast %4 : vector<32x1xf32> to vector<32x8xf32>
    %14 = arith.addf %12, %13 : vector<32x8xf32>
    %cst_11 = arith.constant 0.000000e+00 : f32
    %15 = vector.broadcast %cst_11 : f32 to vector<32x8xf32>
    %16 = arith.maximumf %14, %15 : vector<32x8xf32>
    %cst_12 = arith.constant dense<0.000000e+00> : vector<8x8xf32>
    %17 = tpu.matmul %5, %16, %cst_12 {dimension_numbers = #tpu.dot_dimension_numbers<[1], [0], [0], [1], [0, 0, 1, 1], [], []>} : vector<8x32xf32>, vector<32x8xf32>, vector<8x8xf32> -> vector<8x8xf32>
    %18 = vector.broadcast %6 : vector<8x1xf32> to vector<8x8xf32>
    %19 = arith.addf %17, %18 : vector<8x8xf32>
    %20 = vector.extract_strided_slice %19 {offsets = [0, 0], sizes = [4, 8], strides = [1, 1]} : vector<8x8xf32> to vector<4x8xf32>
    %21 = vector.extract_strided_slice %19 {offsets = [4, 0], sizes = [1, 8], strides = [1, 1]} : vector<8x8xf32> to vector<1x8xf32>
    %cst_13 = arith.constant dense<0.000000e+00> : vector<8xf32>
    %22 = vector.multi_reduction <add>, %20, %cst_13 [0] : vector<4x8xf32> to vector<8xf32>
    %23 = vector.shape_cast %22 : vector<8xf32> to vector<1x8xf32>
    %cst_14 = arith.constant 2.500000e-01 : f32
    %24 = vector.broadcast %cst_14 : f32 to vector<1x8xf32>
    %25 = arith.mulf %23, %24 : vector<1x8xf32>
    %26 = vector.broadcast %21 : vector<1x8xf32> to vector<4x8xf32>
    %27 = arith.addf %26, %20 : vector<4x8xf32>
    %28 = vector.broadcast %25 : vector<1x8xf32> to vector<4x8xf32>
    %29 = arith.subf %27, %28 : vector<4x8xf32>
    %c0_15 = arith.constant 0 : index
    %c0_16 = arith.constant 0 : index
    %30 = vector.load %arg2[%c0_15, %c0_16] : memref<4x8xf32, #tpu.memory_space<vmem>>, vector<4x8xf32>
    tpu.vector_store %arg2[%c0_15, %c0_16], %29 {strides = array<i32>} : memref<4x8xf32, #tpu.memory_space<vmem>>, vector<4x8xf32>,
    return
  }
}

</mosaic_0001>

<bundles_post_ra>
// kernel: tpu_custom_call.1
= control target key start
LH: loop header
LB: loop body
LE: loop exit
PB: predicated region body
PF: predicated region fallthrough
CT: control target
= control target key end

     0   :  { %vm43_vm0 = vcmask 130048   ;;  %v484_v4 = vmov 32   ;;  %s562_s0 = inlined_call_operand.vmem [shape: f32[16,8], index: 0, kind: input, shape index: {}]   ;;  %s563_s1 = inlined_call_operand.vmem [shape: f32[72,40], index: 1, kind: input, shape index: {}]   ;;  %s564_s2 = inlined_call_operand.hbm [shape: f32[4,8], index: 2, kind: output, shape index: {}]  }
   0x1   :  { %v12_v0 = vld [vmem:[%s562_s0] sm:$0xff]  ;;  %v13_v1 = vld [vmem:[%s562_s0 + $0x8] sm:$0xff]  ;;  %454 = vset.pattern.permute.xlu0 %v484_v4  ;;  %v16_v5 = vld [vmem:[%s563_s1 + $0x10] sm:$0xff]  ;;  %455 = vset.pattern.permute.xlu1 %v484_v4 }
   0x2   :  { %v14_v2 = vld [vmem:[%s563_s1] sm:$0xff]  ;;  %v429_v3 = vpack.c.bf16 %v13_v1, %v12_v0 }
   0x3   :  { %398 = vmatprep.mubr.msk.f32.mxu0 %vm43_vm0, %v14_v2  ;;  %25 = vperm.xlu0 %454, %v14_v2  }
   0x4   :  { %7 = vsyncpa [#allocation3], 0  ;;  %430 = vmatprep.subr.bf16.mxu0 %v429_v3  ;;  %35 = vperm.xlu1 %455, %v16_v5   ;;  %v15_v6 = vld [vmem:[%s563_s1 + $0x8] sm:$0xff]  ;;  %v17_v7 = vld [vmem:[%s563_s1 + $0x18] sm:$0xff]  ;;  %vm161_vm1 = vcmask 261120   ;;  %v485_v10 = vmov 33   ;;  %v345_v55 = vlaneseq }
   0x5   :  { %432 = vmatpush3.bf16.msra.mxu0 %v429_v3  ;;  %v18_v8 = vld [vmem:[%s563_s1 + $0x20] sm:$0xff]  ;;  %v19_v9 = vld [vmem:[%s563_s1 + $0x28] sm:$0xff]  ;;  %v20_v11 = vld [vmem:[%s563_s1 + $0x30] sm:$0xff]  ;;  %v486_v31 = vmov 0.0|0.0   ;;  %vm487_vm2 = vmmov 0   ;;  %v488_v32 = vmov 0.0  }
   0x6   :  { %412 = vmatprep.mubr.msk.f32.mxu1 %vm161_vm1, %v18_v8  ;;  %v21_v12 = vld [vmem:[%s563_s1 + $0x38] sm:$0xff]  ;;  %441 = vmatprep.subr.bf16.mxu0 %v486_v31  ;;  %v22_v33 = vld [vmem:[%s563_s1 + $0x40] sm:$0xff]  ;;  %v489_v34 = vmov 34   ;;  %vm336_vm3 = vcmask 60416   ;;  %v346_v59 = vshrl.u32 %v345_v55, 7  ;;  %s490_s1 = smov [#allocation2]  }
   0x7   :  { %30 = vperm.xlu0 %454, %v15_v6   ;;  %s358_s30 = sshll.u32 %s490_s1, 4  ;;  %s359_s30 = int_to_ptr.vmem [resolvable:$true] %s358_s30 }
   0x8   :  { %399 = vmatmul.mubr.msk.f32.vlgmr.msra.gmra.mrb[0].mxu0 %vm43_vm0, %v15_v6  ;;  %40 = vperm.xlu1 %455, %v17_v7   ;;  %v347_v62 = vsub.s32 4, %v346_v59  ;;  %s460_s3 = scalar_lea.vmem %s359_s30, 64  ;;  %p465_p1 = scmp.lt.s32.totalorder %s359_s30, %s359_s30 }
   0x9   :  { %401 = vmatprep.mubr.msk.f32.mxu0 %vm43_vm0, %v16_v5  ;;  %p461_p0 = scmp.ne.s32.totalorder %s359_s30, %s460_s3  ;;  %p466_p2 = scmp.lt.s32.totalorder %s460_s3, %s460_s3 }
   0xb   :  { %456 = vset.pattern.permute.xlu0 %v485_v10  ;;  %p467_p3 = por %p466_p2, %p465_p1 }
   0xc   :  { %402 = vmatmul.mubr.msk.f32.gmra.mrb[2].mxu0 %vm43_vm0, %v17_v7  ;;  %457 = vset.pattern.permute.xlu1 %v485_v10 }
   0xd   :  { %148 = vperm.xlu1 %457, %v19_v9   ;;  %143 = vperm.xlu0 %456, %v18_v8   ;;  %p468_p4 = pnand %p467_p3, %p461_p0 }
   0xe   :  { %426 = vmatprep.mubr.msk.f32.mxu0 %vm487_vm2, %v488_v32 }
  0x11   :  { %153 = vperm.xlu1 %457, %v20_v11   ;;  %158 = vperm.xlu0 %456, %v21_v12  }
  0x15   :  { %458 = vset.pattern.permute.xlu1 %v489_v34  ;;  %459 = vset.pattern.permute.xlu0 %v489_v34 }
  0x16   :  { %261 = vperm.xlu1 %458, %v22_v33  }
  0x82   :  { %v26_v13 = vpop.permute.xlu0 %25 }
  0x83   :  { %v36_v14 = vpop.permute.xlu1 %35 }
  0x86   :  { %v31_v15 = vpop.permute.xlu0 %30 }
  0x87   :  { %v41_v21 = vpop.permute.xlu1 %40 }
  0x8c   :  { %v144_v35 = vpop.permute.xlu0 %143  ;;  %v149_v36 = vpop.permute.xlu1 %148 }
  0x90   :  { %v159_v42 = vpop.permute.xlu0 %158  ;;  %v154_v45 = vpop.permute.xlu1 %153 }
  0x95   :  { %v262_v53 = vpop.permute.xlu1 %261 }
  0xdb   :  { %v400_v16 = vpop.f32.mrb[0].mxu0 }
  0xdc   :  { %v124_v17 = vadd.f32 %v400_v16, %v31_v15  ;;  %v118_v18 = vpop.f32.mrb[1].mxu0 }
  0xdd   :  { %v119_v19 = vadd.f32 %v118_v18, %v26_v13 }
  0xde   :  { %v138_v20 = vmax.f32 %v124_v17, 0.0 }
  0xdf   :  { %v137_v22 = vmax.f32 %v119_v19, 0.0  ;;  %v403_v23 = vpop.f32.mrb[2].mxu0 }
  0xe0   :  { %v134_v24 = vadd.f32 %v403_v23, %v41_v21  ;;  %v128_v25 = vpop.f32.mrb[3].mxu0 }
  0xe1   :  { %v129_v26 = vadd.f32 %v128_v25, %v36_v14  ;;  %v433_v27 = vpack.c.bf16 %v138_v20, %v137_v22 }
  0xe2   :  { %v140_v28 = vmax.f32 %v134_v24, 0.0 }
  0xe3   :  { %v139_v29 = vmax.f32 %v129_v26, 0.0  ;;  %434 = vmatprep.subr.bf16.mxu1 %v433_v27 }
  0xe4   :  { %436 = vmatpush3.bf16.msra.mxu1 %v433_v27 }
  0xe5   :  { %v437_v30 = vpack.c.bf16 %v140_v28, %v139_v29 }
  0xe7   :  { %438 = vmatprep.subr.bf16.mxu1 %v437_v30 }
  0xe8   :  { %440 = vmatpush3.bf16.msra.mxu1 %v437_v30 }
  0xeb   :  { %413 = vmatmul.mubr.msk.f32.vlgmr.msra.gmra.mrb[0].mxu1 %vm161_vm1, %v19_v9 }
  0xec   :  { %415 = vmatprep.mubr.msk.f32.mxu1 %vm161_vm1, %v20_v11 }
  0xef   :  { %416 = vmatmul.mubr.msk.f32.gmra.mrb[2].mxu1 %vm161_vm1, %v21_v12 }
 0x1be   :  { %v414_v37 = vpop.f32.mrb[0].mxu1 }
 0x1bf   :  { %v242_v38 = vadd.f32 %v414_v37, %v149_v36  ;;  %v236_v39 = vpop.f32.mrb[1].mxu1 }
 0x1c0   :  { %v237_v40 = vadd.f32 %v236_v39, %v144_v35 }
 0x1c1   :  { %v256_v41 = vmax.f32 %v242_v38, 0.0 }
 0x1c2   :  { %v255_v43 = vmax.f32 %v237_v40, 0.0  ;;  %v417_v44 = vpop.f32.mrb[2].mxu1 }
 0x1c3   :  { %v252_v46 = vadd.f32 %v417_v44, %v159_v42  ;;  %v246_v47 = vpop.f32.mrb[3].mxu1 }
 0x1c4   :  { %v442_v48 = vpack.c.bf16 %v256_v41, %v255_v43  ;;  %v247_v49 = vadd.f32 %v246_v47, %v154_v45 }
 0x1c5   :  { %v258_v50 = vmax.f32 %v252_v46, 0.0 }
 0x1c6   :  { %v257_v51 = vmax.f32 %v247_v49, 0.0  ;;  %443 = vmatpush3.bf16.msra.mxu0 %v442_v48 }
 0x1c7   :  { %444 = vmatprep.subr.bf16.mxu0 %v486_v31 }
 0x1c8   :  { %v445_v52 = vpack.c.bf16 %v258_v50, %v257_v51 }
 0x1ca   :  { %446 = vmatpush3.bf16.msra.mxu0 %v445_v52 }
 0x1cd   :  { %427 = vmatmul.mubr.msk.f32.vlgmr.msra.gmra.mrb[4].mxu0 %vm161_vm1, %v22_v33 }
 0x2a0   :  { %v332_v54 = vpop.f32.mrb[4].mxu0 }
 0x2a1   :  { %v333_v56 = vadd.f32 %v332_v54, %v262_v53  ;;  %v428_v57 = vpop.f32.mrb[5].mxu0 }
 0x2a3   :  { %v337_v58 = vsel %vm336_vm3, %v333_v56, 0.0  ;;  %v348_v1 = vrot.slane %v333_v56, %v347_v62 }
 0x2a4   :  { %v338_v60 = vrot.slane %v337_v58, 4 }
 0x2a5   :  { %v349_v4 = vadd.f32 %v348_v1, %v333_v56 }
 0x2a6   :  { %v339_v61 = vadd.f32 %v338_v60, %v337_v58 }
 0x2a8   :  { %v340_v63 = vrot.slane %v339_v61, 2 }
 0x2aa   :  { %v341_v0 = vadd.f32 %v340_v63, %v339_v61 }
 0x2ac   :  { %v342_v2 = vrot.slane %v341_v0, 1 }
 0x2ae   :  { %v343_v3 = vadd.f32 %v342_v2, %v341_v0 }
 0x2b0   :  { %v344_v5 = vmul.f32 0.25, %v343_v3 }
 0x2b2   :  { %v350_v6 = vsub.f32 %v349_v4, %v344_v5 }
 0x2b4   :  { %351 = vst.msk [vmem:[#allocation2] sm:$0xf] %vm336_vm3, %v350_v6 }
 0x2b5   :  { %471 = shalt.err (!%p468_p4)
}
 0x2b6   :  { %s472_s6 = scalar_lea.hbm %s564_s2, 64 }
 0x2b7   :  { %p473_p5 = scmp.ne.s32.totalorder %s564_s2, %s472_s6  ;;  %p476_p6 = scmp.lt.u32.totalorder %s472_s6, %s564_s2 }
 0x2b9   :  { %p478_p7 = pnand %p476_p6, %p473_p5 }
 0x2bb   :  { %481 = shalt.err (!%p478_p7)
}
 0x2bc   :  { %361 = dma.vmem_to_hbm [thread:$0]  %s359_s30, 64, %s564_s2, [#allocation3]  }
 0x2bd   :  { %482 = dma.done.wait [#allocation3], 64  }
 0x2be   :  { %483 = vsyncadd [#allocation3], 4294967232 }
 0x2bf   :  { %365 = vsyncpa [#allocation3], 1 }

</bundles_post_ra>
